<compile_context>
chip_gen: v7x
topology: tpu7x:2x2x1
jax: 0.10.0
libtpu: 0.0.40
codegen_flags: <defaults>
</compile_context>

<pallas_src>
import jax
import jax.numpy as jnp
from jax.experimental import pallas as pl
from jax.experimental.pallas import tpu as pltpu

_LANE = 128


def _round_up(n, m):
  return ((n + m - 1) // m) * m


# ---------------------------------------------------------------------------
# Parameter preparation (runs once at load time)
# ---------------------------------------------------------------------------
def _weight_norm(v, g):
  """v: (Cout, Cin, K), g: (Cout,) -> g * v / ||v||  (norm over (Cin, K))."""
  norm = jnp.sqrt(jnp.sum(v * v, axis=(1, 2), keepdims=True))
  return g.reshape(-1, 1, 1) * v / norm


def _prep_conv(v, g, b, cin_p, cout_p):
  """Torch (Cout, Cin, K) weight-normed conv -> (K, cin_p, cout_p) bf16 weight
  + (1, cout_p) f32 bias, zero-padded on the channel axes."""
  w = _weight_norm(v, g)                                   # (Cout, Cin, K)
  cout, cin, _ = w.shape
  w = jnp.transpose(w, (2, 1, 0))                          # (K, Cin, Cout)
  w = jnp.pad(w, ((0, 0), (0, cin_p - cin), (0, cout_p - cout)))
  bp = jnp.pad(b, (0, cout_p - cout)).reshape(1, cout_p).astype(jnp.float32)
  return w.astype(jnp.bfloat16), bp


def _prep_1x1(wd, bd, cin_p, cout_p):
  cout, cin, _ = wd.shape
  w = jnp.pad(wd[:, :, 0].T, ((0, cin_p - cin), (0, cout_p - cout)))
  bp = jnp.pad(bd, (0, cout_p - cout)).reshape(1, cout_p).astype(jnp.float32)
  return w.astype(jnp.bfloat16), bp


def _prep_head(lin_w, lin_b, c_p, o_p):
  o, c = lin_w.shape
  w = jnp.pad(lin_w.T, ((0, c_p - c), (0, o_p - o)))
  bp = jnp.pad(lin_b, (0, o_p - o)).reshape(1, o_p).astype(jnp.float32)
  return w.astype(jnp.bfloat16), bp


def prepare_tcn(params, input_size, output_size):
  """Hoisted weight prep: weight_norm, transpose, pad, bf16 cast — once."""
  weights = []
  block_cfgs = []
  cin_p0 = _round_up(input_size, _LANE)
  cin_p = cin_p0
  for i, blk in enumerate(params["blocks"]):
    cout, _, K = blk["v1"].shape
    cout_p = _round_up(cout, _LANE)
    dil = 2 ** i
    with_down = "wd" in blk
    w1, b1 = _prep_conv(blk["v1"], blk["g1"], blk["b1"], cin_p, cout_p)
    w2, b2 = _prep_conv(blk["v2"], blk["g2"], blk["b2"], cout_p, cout_p)
    weights += [w1, b1, w2, b2]
    if with_down:
      wd, bd = _prep_1x1(blk["wd"], blk["bd"], cin_p, cout_p)
      weights += [wd, bd]
    block_cfgs.append((cin_p, cout_p, K, dil, with_down))
    cin_p = cout_p
  o_p = _round_up(output_size, _LANE)
  wl, bl = _prep_head(params["lin_w"], params["lin_b"], cin_p, o_p)
  weights += [wl, bl]
  cfg = dict(blocks=tuple(block_cfgs), cin_p=cin_p0, o_p=o_p,
             input_size=input_size, output_size=output_size)
  return tuple(weights), cfg


# ---------------------------------------------------------------------------
# Fused whole-network kernel
# ---------------------------------------------------------------------------
def _causal_conv_relu(x, w_ref, b_ref, Bblk, T, cin, cout, K, dil):
  """Causal dilated conv + bias + relu via per-tap matmul accumulation.

  x: (Bblk, T, cin) f32 value resident in VMEM.
  w_ref: (K, cin, cout) bf16 weight ref.  No (T, K*cin) concat is built; each
  tap uses a zero-left-halo shifted view (shift applied per batch element, so
  flattening (Bblk, T) -> Bblk*T for the MXU never leaks across sequences).
  Returns relu(conv(x) + b) as f32 (Bblk, T, cout).
  """
  acc = jnp.dot(x.astype(jnp.bfloat16).reshape(Bblk * T, cin),
                w_ref[K - 1], preferred_element_type=jnp.float32)
  for j in range(K - 1):
    s = (K - 1 - j) * dil
    if s >= T:
      continue  # this tap only sees the zero halo -> contributes nothing
    xs = jnp.concatenate(
        [jnp.zeros((Bblk, s, cin), jnp.float32), x[:, :T - s, :]], axis=1)
    acc = acc + jnp.dot(xs.astype(jnp.bfloat16).reshape(Bblk * T, cin),
                        w_ref[j], preferred_element_type=jnp.float32)
  acc = jnp.maximum(acc + b_ref[...], 0.0)
  return acc.reshape(Bblk, T, cout)


def _make_tcn_call(B_pad, Bblk, T, cfg, vmem_limit):
  blocks = cfg["blocks"]
  cin0_p = cfg["cin_p"]
  o_p = cfg["o_p"]
  c_last_p = blocks[-1][1]

  def kernel(*refs):
    x_ref = refs[0]
    out_ref = refs[-1]
    h = x_ref[...].astype(jnp.float32)          # (Bblk, T, cin0_p), stays in VMEM
    idx = 1
    for (cin_p, cout_p, K, dil, with_down) in blocks:
      w1, b1, w2, b2 = refs[idx], refs[idx + 1], refs[idx + 2], refs[idx + 3]
      idx += 4
      a = _causal_conv_relu(h, w1, b1, Bblk, T, cin_p, cout_p, K, dil)
      o = _causal_conv_relu(a, w2, b2, Bblk, T, cout_p, cout_p, K, dil)
      if with_down:
        wd, bd = refs[idx], refs[idx + 1]
        idx += 2
        res = jnp.dot(h.astype(jnp.bfloat16).reshape(Bblk * T, cin_p),
                      wd[...], preferred_element_type=jnp.float32)
        res = (res + bd[...]).reshape(Bblk, T, cout_p)
      else:
        res = h
      # residual add + final relu fused directly into the next layer's input.
      h = jnp.maximum(o + res, 0.0)
    # Fused Linear head on the last timestep: output[:, -1, :] @ W^T + b.
    wl, bl = refs[idx], refs[idx + 1]
    last = h[:, T - 1, :].astype(jnp.bfloat16)   # (Bblk, c_last_p)
    pred = jnp.dot(last, wl[...], preferred_element_type=jnp.float32)
    out_ref[...] = pred + bl[...]

  in_specs = [pl.BlockSpec((Bblk, T, cin0_p), lambda b: (b, 0, 0))]
  for (cin_p, cout_p, K, dil, with_down) in blocks:
    in_specs += [
        pl.BlockSpec((K, cin_p, cout_p), lambda b: (0, 0, 0)),
        pl.BlockSpec((1, cout_p), lambda b: (0, 0)),
        pl.BlockSpec((K, cout_p, cout_p), lambda b: (0, 0, 0)),
        pl.BlockSpec((1, cout_p), lambda b: (0, 0)),
    ]
    if with_down:
      in_specs += [pl.BlockSpec((cin_p, cout_p), lambda b: (0, 0)),
                   pl.BlockSpec((1, cout_p), lambda b: (0, 0))]
  in_specs += [pl.BlockSpec((c_last_p, o_p), lambda b: (0, 0)),
               pl.BlockSpec((1, o_p), lambda b: (0, 0))]

  return pl.pallas_call(
      kernel,
      out_shape=jax.ShapeDtypeStruct((B_pad, o_p), jnp.float32),
      grid_spec=pltpu.PrefetchScalarGridSpec(
          num_scalar_prefetch=0,
          grid=(B_pad // Bblk,),
          in_specs=in_specs,
          out_specs=pl.BlockSpec((Bblk, o_p), lambda b: (b, 0))),
      compiler_params=pltpu.CompilerParams(
          dimension_semantics=("parallel",),
          vmem_limit_bytes=int(vmem_limit)),
  )


def _vmem_limit_bytes(Bblk, T, cfg, weights):
  """Scoped-VMEM request computed from actual block sizes, capped below the
  chip's physical VMEM (generation-aware via get_tpu_info when available)."""
  weight_bytes = sum(int(w.size) * w.dtype.itemsize for w in weights)
  max_c = max(max(c[0], c[1]) for c in cfg["blocks"])
  x_bytes = Bblk * T * cfg["cin_p"] * 2
  out_bytes = Bblk * cfg["o_p"] * 4
  inter = 8 * Bblk * T * max_c * 4          # live f32/bf16 temps inside kernel
  est = 2 * (x_bytes + out_bytes + weight_bytes) + inter + 4 * 1024 * 1024
  try:
    cap = int(pltpu.get_tpu_info().vmem_capacity_bytes) - 16 * 1024 * 1024
  except Exception:
    cap = 48 * 1024 * 1024                  # conservative for v7x (64 MiB)
  cap = max(cap, 16 * 1024 * 1024)
  return min(max(est, 16 * 1024 * 1024), cap, 100 * 1024 * 1024)


def tcn_forward(x, prepared):
  """x: (B, T, input_size) -> (B, output_size).  Matches TCN.forward
  (inference semantics; dropout = identity)."""
  weights, cfg = prepared
  B, T, cin = x.shape
  assert cin == cfg["input_size"]
  cin_p = cfg["cin_p"]
  Bblk = B if B <= 8 else 8                 # batch blocking (MXU M = Bblk*T)
  B_pad = _round_up(B, Bblk)
  xp = jnp.pad(x, ((0, B_pad - B), (0, 0), (0, cin_p - cin))).astype(jnp.float32)
  call = _make_tcn_call(B_pad, Bblk, T, cfg,
                        _vmem_limit_bytes(Bblk, T, cfg, weights))
  out = call(xp, *weights)
  return out[:B, :cfg["output_size"]]


# ---------------------------------------------------------------------------
# Pure-JAX f32 reference (for validation) and parameter init
# ---------------------------------------------------------------------------
def _ref_causal_conv(x, w, b, dil):
  Bt, T, _ = x.shape
  cout, _, K = w.shape
  y = jnp.zeros((Bt, T, cout), jnp.float32) + b
  for j in range(K):
    s = (K - 1 - j) * dil
    xs = jnp.pad(x, ((0, 0), (s, 0), (0, 0)))[:, :T, :]
    y = y + jnp.einsum("btc,oc->bto", xs, w[:, :, j])
  return y


def tcn_reference(x, params):
  h = x.astype(jnp.float32)
  for i, blk in enumerate(params["blocks"]):
    dil = 2 ** i
    a = jax.nn.relu(_ref_causal_conv(h, _weight_norm(blk["v1"], blk["g1"]),
                                     blk["b1"], dil))
    o = jax.nn.relu(_ref_causal_conv(a, _weight_norm(blk["v2"], blk["g2"]),
                                     blk["b2"], dil))
    if "wd" in blk:
      res = jnp.einsum("btc,oc->bto", h, blk["wd"][:, :, 0]) + blk["bd"]
    else:
      res = h
    h = jax.nn.relu(o + res)
  return h[:, -1, :] @ params["lin_w"].T + params["lin_b"]


def init_params(key, input_size, output_size, num_channels, kernel_size):
  params = {"blocks": []}
  cin = input_size
  for i, cout in enumerate(num_channels):
    ks = jax.random.split(jax.random.fold_in(key, i), 8)
    blk = {
        "v1": 0.01 * jax.random.normal(ks[0], (cout, cin, kernel_size),
                                       jnp.float32),
        "g1": 0.5 + jax.random.uniform(ks[1], (cout,), jnp.float32),
        "b1": 0.01 * jax.random.normal(ks[2], (cout,), jnp.float32),
        "v2": 0.01 * jax.random.normal(ks[3], (cout, cout, kernel_size),
                                       jnp.float32),
        "g2": 0.5 + jax.random.uniform(ks[4], (cout,), jnp.float32),
        "b2": 0.01 * jax.random.normal(ks[5], (cout,), jnp.float32),
    }
    if cin != cout:
      blk["wd"] = 0.01 * jax.random.normal(ks[6], (cout, cin, 1), jnp.float32)
      blk["bd"] = 0.01 * jax.random.normal(ks[7], (cout,), jnp.float32)
    params["blocks"].append(blk)
    cin = cout
  kw, kb = jax.random.split(jax.random.fold_in(key, 1000))
  bound = 1.0 / float(cin) ** 0.5
  params["lin_w"] = jax.random.uniform(kw, (output_size, cin), jnp.float32,
                                       -bound, bound)
  params["lin_b"] = jax.random.uniform(kb, (output_size,), jnp.float32,
                                       -bound, bound)
  return params


if __name__ == "__main__":
  key = jax.random.PRNGKey(0)
  B, T = 2, 16
  input_size, output_size = 4, 3
  num_channels = [8, 8]
  kernel_size = 2
  # dropout = 0.2 -> identity at inference (see TODO at top)

  params = init_params(key, input_size, output_size, num_channels, kernel_size)
  x = jax.random.normal(jax.random.fold_in(key, 999), (B, T, input_size),
                        jnp.float32)

  prepared = prepare_tcn(params, input_size, output_size)   # once, load time
  fwd = jax.jit(lambda xx: tcn_forward(xx, prepared))
  pred = jax.block_until_ready(fwd(x))

  assert pred.shape == (B, output_size)
  assert bool(jnp.all(jnp.isfinite(pred)))
  ref = tcn_reference(x, params)
  err = float(jnp.max(jnp.abs(pred - ref)))
  assert err < 3e-2, f"max abs error vs reference: {err}"
  print("KERNEL_OK")
</pallas_src>

<mosaic_0001>
module attributes {stable_mosaic.version = 11 : i64} {
  func.func @kernel(%arg0: i32, %arg1: memref<2x16x128xf32, #tpu.memory_space<vmem>>, %arg2: memref<2x128x128xbf16, #tpu.memory_space<vmem>>, %arg3: memref<1x128xf32, #tpu.memory_space<vmem>>, %arg4: memref<2x128x128xbf16, #tpu.memory_space<vmem>>, %arg5: memref<1x128xf32, #tpu.memory_space<vmem>>, %arg6: memref<128x128xbf16, #tpu.memory_space<vmem>>, %arg7: memref<1x128xf32, #tpu.memory_space<vmem>>, %arg8: memref<2x128x128xbf16, #tpu.memory_space<vmem>>, %arg9: memref<1x128xf32, #tpu.memory_space<vmem>>, %arg10: memref<2x128x128xbf16, #tpu.memory_space<vmem>>, %arg11: memref<1x128xf32, #tpu.memory_space<vmem>>, %arg12: memref<128x128xbf16, #tpu.memory_space<vmem>>, %arg13: memref<1x128xf32, #tpu.memory_space<vmem>>, %arg14: memref<2x128xf32, #tpu.memory_space<vmem>>) attributes {dimension_semantics = [#tpu.dimension_semantics<parallel>], iteration_bounds = array<i64: 1>, scalar_prefetch = 0 : i64, scratch_operands = 0 : i64, tpu.core_type = #tpu.core_type<tc>, window_params = [{transform_indices = @transform_0, window_bounds = array<i64: 2, 16, 128>}, {pipeline_mode = #tpu.pipeline_mode<synchronous>, transform_indices = @transform_1, window_bounds = array<i64: 2, 128, 128>}, {pipeline_mode = #tpu.pipeline_mode<synchronous>, transform_indices = @transform_2, window_bounds = array<i64: 1, 128>}, {pipeline_mode = #tpu.pipeline_mode<synchronous>, transform_indices = @transform_3, window_bounds = array<i64: 2, 128, 128>}, {pipeline_mode = #tpu.pipeline_mode<synchronous>, transform_indices = @transform_4, window_bounds = array<i64: 1, 128>}, {pipeline_mode = #tpu.pipeline_mode<synchronous>, transform_indices = @transform_5, window_bounds = array<i64: 128, 128>}, {pipeline_mode = #tpu.pipeline_mode<synchronous>, transform_indices = @transform_6, window_bounds = array<i64: 1, 128>}, {pipeline_mode = #tpu.pipeline_mode<synchronous>, transform_indices = @transform_7, window_bounds = array<i64: 2, 128, 128>}, {pipeline_mode = #tpu.pipeline_mode<synchronous>, transform_indices = @transform_8, window_bounds = array<i64: 1, 128>}, {pipeline_mode = #tpu.pipeline_mode<synchronous>, transform_indices = @transform_9, window_bounds = array<i64: 2, 128, 128>}, {pipeline_mode = #tpu.pipeline_mode<synchronous>, transform_indices = @transform_10, window_bounds = array<i64: 1, 128>}, {pipeline_mode = #tpu.pipeline_mode<synchronous>, transform_indices = @transform_11, window_bounds = array<i64: 128, 128>}, {pipeline_mode = #tpu.pipeline_mode<synchronous>, transform_indices = @transform_12, window_bounds = array<i64: 1, 128>}, {transform_indices = @transform_13, window_bounds = array<i64: 2, 128>}]} {
    %c0 = arith.constant 0 : index
    %c0_0 = arith.constant 0 : index
    %c0_1 = arith.constant 0 : index
    %0 = vector.load %arg1[%c0, %c0_0, %c0_1] : memref<2x16x128xf32, #tpu.memory_space<vmem>>, vector<2x16x128xf32>
    %1 = arith.truncf %0 : vector<2x16x128xf32> to vector<2x16x128xbf16>
    %2 = vector.shape_cast %1 : vector<2x16x128xbf16> to vector<32x128xbf16>
    %c1 = arith.constant 1 : index
    %c0_2 = arith.constant 0 : index
    %c0_3 = arith.constant 0 : index
    %3 = vector.load %arg2[%c1, %c0_2, %c0_3] : memref<2x128x128xbf16, #tpu.memory_space<vmem>>, vector<1x128x128xbf16>
    %4 = vector.shape_cast %3 : vector<1x128x128xbf16> to vector<128x128xbf16>
    %cst = arith.constant dense<0.000000e+00> : vector<32x128xf32>
    %5 = tpu.matmul %2, %4, %cst {dimension_numbers = #tpu.dot_dimension_numbers<[1], [0], [0], [1], [0, 0, 1, 1], [], []>} : vector<32x128xbf16>, vector<128x128xbf16>, vector<32x128xf32> -> vector<32x128xf32>
    %cst_4 = arith.constant 0.000000e+00 : f32
    %6 = vector.broadcast %cst_4 : f32 to vector<2x1x128xf32>
    %7 = vector.extract_strided_slice %0 {offsets = [0, 0, 0], sizes = [2, 15, 128], strides = [1, 1, 1]} : vector<2x16x128xf32> to vector<2x15x128xf32>
    %8 = tpu.concatenate %6, %7 in 1 : vector<2x1x128xf32>, vector<2x15x128xf32> -> vector<2x16x128xf32>
    %9 = arith.truncf %8 : vector<2x16x128xf32> to vector<2x16x128xbf16>
    %10 = vector.shape_cast %9 : vector<2x16x128xbf16> to vector<32x128xbf16>
    %c0_5 = arith.constant 0 : index
    %c0_6 = arith.constant 0 : index
    %c0_7 = arith.constant 0 : index
    %11 = vector.load %arg2[%c0_5, %c0_6, %c0_7] : memref<2x128x128xbf16, #tpu.memory_space<vmem>>, vector<1x128x128xbf16>
    %12 = vector.shape_cast %11 : vector<1x128x128xbf16> to vector<128x128xbf16>
    %cst_8 = arith.constant dense<0.000000e+00> : vector<32x128xf32>
    %13 = tpu.matmul %10, %12, %cst_8 {dimension_numbers = #tpu.dot_dimension_numbers<[1], [0], [0], [1], [0, 0, 1, 1], [], []>} : vector<32x128xbf16>, vector<128x128xbf16>, vector<32x128xf32> -> vector<32x128xf32>
    %14 = arith.addf %5, %13 : vector<32x128xf32>
    %c0_9 = arith.constant 0 : index
    %c0_10 = arith.constant 0 : index
    %15 = vector.load %arg3[%c0_9, %c0_10] : memref<1x128xf32, #tpu.memory_space<vmem>>, vector<1x128xf32>
    %16 = vector.broadcast %15 : vector<1x128xf32> to vector<32x128xf32>
    %17 = arith.addf %14, %16 : vector<32x128xf32>
    %cst_11 = arith.constant 0.000000e+00 : f32
    %18 = vector.broadcast %cst_11 : f32 to vector<32x128xf32>
    %19 = arith.maximumf %17, %18 : vector<32x128xf32>
    %20 = vector.shape_cast %19 : vector<32x128xf32> to vector<2x16x128xf32>
    %21 = arith.truncf %20 : vector<2x16x128xf32> to vector<2x16x128xbf16>
    %22 = vector.shape_cast %21 : vector<2x16x128xbf16> to vector<32x128xbf16>
    %c1_12 = arith.constant 1 : index
    %c0_13 = arith.constant 0 : index
    %c0_14 = arith.constant 0 : index
    %23 = vector.load %arg4[%c1_12, %c0_13, %c0_14] : memref<2x128x128xbf16, #tpu.memory_space<vmem>>, vector<1x128x128xbf16>
    %24 = vector.shape_cast %23 : vector<1x128x128xbf16> to vector<128x128xbf16>
    %cst_15 = arith.constant dense<0.000000e+00> : vector<32x128xf32>
    %25 = tpu.matmul %22, %24, %cst_15 {dimension_numbers = #tpu.dot_dimension_numbers<[1], [0], [0], [1], [0, 0, 1, 1], [], []>} : vector<32x128xbf16>, vector<128x128xbf16>, vector<32x128xf32> -> vector<32x128xf32>
    %cst_16 = arith.constant 0.000000e+00 : f32
    %26 = vector.broadcast %cst_16 : f32 to vector<2x1x128xf32>
    %27 = vector.extract_strided_slice %20 {offsets = [0, 0, 0], sizes = [2, 15, 128], strides = [1, 1, 1]} : vector<2x16x128xf32> to vector<2x15x128xf32>
    %28 = tpu.concatenate %26, %27 in 1 : vector<2x1x128xf32>, vector<2x15x128xf32> -> vector<2x16x128xf32>
    %29 = arith.truncf %28 : vector<2x16x128xf32> to vector<2x16x128xbf16>
    %30 = vector.shape_cast %29 : vector<2x16x128xbf16> to vector<32x128xbf16>
    %c0_17 = arith.constant 0 : index
    %c0_18 = arith.constant 0 : index
    %c0_19 = arith.constant 0 : index
    %31 = vector.load %arg4[%c0_17, %c0_18, %c0_19] : memref<2x128x128xbf16, #tpu.memory_space<vmem>>, vector<1x128x128xbf16>
    %32 = vector.shape_cast %31 : vector<1x128x128xbf16> to vector<128x128xbf16>
    %cst_20 = arith.constant dense<0.000000e+00> : vector<32x128xf32>
    %33 = tpu.matmul %30, %32, %cst_20 {dimension_numbers = #tpu.dot_dimension_numbers<[1], [0], [0], [1], [0, 0, 1, 1], [], []>} : vector<32x128xbf16>, vector<128x128xbf16>, vector<32x128xf32> -> vector<32x128xf32>
    %34 = arith.addf %25, %33 : vector<32x128xf32>
    %c0_21 = arith.constant 0 : index
    %c0_22 = arith.constant 0 : index
    %35 = vector.load %arg5[%c0_21, %c0_22] : memref<1x128xf32, #tpu.memory_space<vmem>>, vector<1x128xf32>
    %36 = vector.broadcast %35 : vector<1x128xf32> to vector<32x128xf32>
    %37 = arith.addf %34, %36 : vector<32x128xf32>
    %cst_23 = arith.constant 0.000000e+00 : f32
    %38 = vector.broadcast %cst_23 : f32 to vector<32x128xf32>
    %39 = arith.maximumf %37, %38 : vector<32x128xf32>
    %40 = vector.shape_cast %39 : vector<32x128xf32> to vector<2x16x128xf32>
    %41 = arith.truncf %0 : vector<2x16x128xf32> to vector<2x16x128xbf16>
    %42 = vector.shape_cast %41 : vector<2x16x128xbf16> to vector<32x128xbf16>
    %c0_24 = arith.constant 0 : index
    %c0_25 = arith.constant 0 : index
    %43 = vector.load %arg6[%c0_24, %c0_25] : memref<128x128xbf16, #tpu.memory_space<vmem>>, vector<128x128xbf16>
    %cst_26 = arith.constant dense<0.000000e+00> : vector<32x128xf32>
    %44 = tpu.matmul %42, %43, %cst_26 {dimension_numbers = #tpu.dot_dimension_numbers<[1], [0], [0], [1], [0, 0, 1, 1], [], []>} : vector<32x128xbf16>, vector<128x128xbf16>, vector<32x128xf32> -> vector<32x128xf32>
    %c0_27 = arith.constant 0 : index
    %c0_28 = arith.constant 0 : index
    %45 = vector.load %arg7[%c0_27, %c0_28] : memref<1x128xf32, #tpu.memory_space<vmem>>, vector<1x128xf32>
    %46 = vector.broadcast %45 : vector<1x128xf32> to vector<32x128xf32>
    %47 = arith.addf %44, %46 : vector<32x128xf32>
    %48 = vector.shape_cast %47 : vector<32x128xf32> to vector<2x16x128xf32>
    %49 = arith.addf %40, %48 : vector<2x16x128xf32>
    %cst_29 = arith.constant 0.000000e+00 : f32
    %50 = vector.broadcast %cst_29 : f32 to vector<2x16x128xf32>
    %51 = arith.maximumf %49, %50 : vector<2x16x128xf32>
    %52 = arith.truncf %51 : vector<2x16x128xf32> to vector<2x16x128xbf16>
    %53 = vector.shape_cast %52 : vector<2x16x128xbf16> to vector<32x128xbf16>
    %c1_30 = arith.constant 1 : index
    %c0_31 = arith.constant 0 : index
    %c0_32 = arith.constant 0 : index
    %54 = vector.load %arg8[%c1_30, %c0_31, %c0_32] : memref<2x128x128xbf16, #tpu.memory_space<vmem>>, vector<1x128x128xbf16>
    %55 = vector.shape_cast %54 : vector<1x128x128xbf16> to vector<128x128xbf16>
    %cst_33 = arith.constant dense<0.000000e+00> : vector<32x128xf32>
    %56 = tpu.matmul %53, %55, %cst_33 {dimension_numbers = #tpu.dot_dimension_numbers<[1], [0], [0], [1], [0, 0, 1, 1], [], []>} : vector<32x128xbf16>, vector<128x128xbf16>, vector<32x128xf32> -> vector<32x128xf32>
    %cst_34 = arith.constant 0.000000e+00 : f32
    %57 = vector.broadcast %cst_34 : f32 to vector<2x2x128xf32>
    %58 = vector.extract_strided_slice %51 {offsets = [0, 0, 0], sizes = [2, 14, 128], strides = [1, 1, 1]} : vector<2x16x128xf32> to vector<2x14x128xf32>
    %59 = tpu.concatenate %57, %58 in 1 : vector<2x2x128xf32>, vector<2x14x128xf32> -> vector<2x16x128xf32>
    %60 = arith.truncf %59 : vector<2x16x128xf32> to vector<2x16x128xbf16>
    %61 = vector.shape_cast %60 : vector<2x16x128xbf16> to vector<32x128xbf16>
    %c0_35 = arith.constant 0 : index
    %c0_36 = arith.constant 0 : index
    %c0_37 = arith.constant 0 : index
    %62 = vector.load %arg8[%c0_35, %c0_36, %c0_37] : memref<2x128x128xbf16, #tpu.memory_space<vmem>>, vector<1x128x128xbf16>
    %63 = vector.shape_cast %62 : vector<1x128x128xbf16> to vector<128x128xbf16>
    %cst_38 = arith.constant dense<0.000000e+00> : vector<32x128xf32>
    %64 = tpu.matmul %61, %63, %cst_38 {dimension_numbers = #tpu.dot_dimension_numbers<[1], [0], [0], [1], [0, 0, 1, 1], [], []>} : vector<32x128xbf16>, vector<128x128xbf16>, vector<32x128xf32> -> vector<32x128xf32>
    %65 = arith.addf %56, %64 : vector<32x128xf32>
    %c0_39 = arith.constant 0 : index
    %c0_40 = arith.constant 0 : index
    %66 = vector.load %arg9[%c0_39, %c0_40] : memref<1x128xf32, #tpu.memory_space<vmem>>, vector<1x128xf32>
    %67 = vector.broadcast %66 : vector<1x128xf32> to vector<32x128xf32>
    %68 = arith.addf %65, %67 : vector<32x128xf32>
    %cst_41 = arith.constant 0.000000e+00 : f32
    %69 = vector.broadcast %cst_41 : f32 to vector<32x128xf32>
    %70 = arith.maximumf %68, %69 : vector<32x128xf32>
    %71 = vector.shape_cast %70 : vector<32x128xf32> to vector<2x16x128xf32>
    %72 = arith.truncf %71 : vector<2x16x128xf32> to vector<2x16x128xbf16>
    %73 = vector.shape_cast %72 : vector<2x16x128xbf16> to vector<32x128xbf16>
    %c1_42 = arith.constant 1 : index
    %c0_43 = arith.constant 0 : index
    %c0_44 = arith.constant 0 : index
    %74 = vector.load %arg10[%c1_42, %c0_43, %c0_44] : memref<2x128x128xbf16, #tpu.memory_space<vmem>>, vector<1x128x128xbf16>
    %75 = vector.shape_cast %74 : vector<1x128x128xbf16> to vector<128x128xbf16>
    %cst_45 = arith.constant dense<0.000000e+00> : vector<32x128xf32>
    %76 = tpu.matmul %73, %75, %cst_45 {dimension_numbers = #tpu.dot_dimension_numbers<[1], [0], [0], [1], [0, 0, 1, 1], [], []>} : vector<32x128xbf16>, vector<128x128xbf16>, vector<32x128xf32> -> vector<32x128xf32>
    %cst_46 = arith.constant 0.000000e+00 : f32
    %77 = vector.broadcast %cst_46 : f32 to vector<2x2x128xf32>
    %78 = vector.extract_strided_slice %71 {offsets = [0, 0, 0], sizes = [2, 14, 128], strides = [1, 1, 1]} : vector<2x16x128xf32> to vector<2x14x128xf32>
    %79 = tpu.concatenate %77, %78 in 1 : vector<2x2x128xf32>, vector<2x14x128xf32> -> vector<2x16x128xf32>
    %80 = arith.truncf %79 : vector<2x16x128xf32> to vector<2x16x128xbf16>
    %81 = vector.shape_cast %80 : vector<2x16x128xbf16> to vector<32x128xbf16>
    %c0_47 = arith.constant 0 : index
    %c0_48 = arith.constant 0 : index
    %c0_49 = arith.constant 0 : index
    %82 = vector.load %arg10[%c0_47, %c0_48, %c0_49] : memref<2x128x128xbf16, #tpu.memory_space<vmem>>, vector<1x128x128xbf16>
    %83 = vector.shape_cast %82 : vector<1x128x128xbf16> to vector<128x128xbf16>
    %cst_50 = arith.constant dense<0.000000e+00> : vector<32x128xf32>
    %84 = tpu.matmul %81, %83, %cst_50 {dimension_numbers = #tpu.dot_dimension_numbers<[1], [0], [0], [1], [0, 0, 1, 1], [], []>} : vector<32x128xbf16>, vector<128x128xbf16>, vector<32x128xf32> -> vector<32x128xf32>
    %85 = arith.addf %76, %84 : vector<32x128xf32>
    %c0_51 = arith.constant 0 : index
    %c0_52 = arith.constant 0 : index
    %86 = vector.load %arg11[%c0_51, %c0_52] : memref<1x128xf32, #tpu.memory_space<vmem>>, vector<1x128xf32>
    %87 = vector.broadcast %86 : vector<1x128xf32> to vector<32x128xf32>
    %88 = arith.addf %85, %87 : vector<32x128xf32>
    %cst_53 = arith.constant 0.000000e+00 : f32
    %89 = vector.broadcast %cst_53 : f32 to vector<32x128xf32>
    %90 = arith.maximumf %88, %89 : vector<32x128xf32>
    %91 = vector.shape_cast %90 : vector<32x128xf32> to vector<2x16x128xf32>
    %92 = arith.addf %91, %51 : vector<2x16x128xf32>
    %cst_54 = arith.constant 0.000000e+00 : f32
    %93 = vector.broadcast %cst_54 : f32 to vector<2x16x128xf32>
    %94 = arith.maximumf %92, %93 : vector<2x16x128xf32>
    %95 = vector.extract_strided_slice %94 {offsets = [0, 15, 0], sizes = [2, 1, 128], strides = [1, 1, 1]} : vector<2x16x128xf32> to vector<2x1x128xf32>
    %96 = vector.shape_cast %95 : vector<2x1x128xf32> to vector<2x128xf32>
    %97 = arith.truncf %96 : vector<2x128xf32> to vector<2x128xbf16>
    %c0_55 = arith.constant 0 : index
    %c0_56 = arith.constant 0 : index
    %98 = vector.load %arg12[%c0_55, %c0_56] : memref<128x128xbf16, #tpu.memory_space<vmem>>, vector<128x128xbf16>
    %cst_57 = arith.constant dense<0.000000e+00> : vector<2x128xf32>
    %99 = tpu.matmul %97, %98, %cst_57 {dimension_numbers = #tpu.dot_dimension_numbers<[1], [0], [0], [1], [0, 0, 1, 1], [], []>} : vector<2x128xbf16>, vector<128x128xbf16>, vector<2x128xf32> -> vector<2x128xf32>
    %c0_58 = arith.constant 0 : index
    %c0_59 = arith.constant 0 : index
    %100 = vector.load %arg13[%c0_58, %c0_59] : memref<1x128xf32, #tpu.memory_space<vmem>>, vector<1x128xf32>
    %101 = vector.broadcast %100 : vector<1x128xf32> to vector<2x128xf32>
    %102 = arith.addf %99, %101 : vector<2x128xf32>
    %c0_60 = arith.constant 0 : index
    %c0_61 = arith.constant 0 : index
    %103 = vector.load %arg14[%c0_60, %c0_61] : memref<2x128xf32, #tpu.memory_space<vmem>>, vector<2x128xf32>
    tpu.vector_store %arg14[%c0_60, %c0_61], %102 {strides = array<i32>} : memref<2x128xf32, #tpu.memory_space<vmem>>, vector<2x128xf32>,
    return
  }
  func.func @transform_0(%arg0: i32) -> (i32, i32, i32) {
    %c0_i32 = arith.constant 0 : i32
    %c0_i32_0 = arith.constant 0 : i32
    %c0_i32_1 = arith.constant 0 : i32
    return %arg0, %c0_i32, %c0_i32_0 : i32, i32, i32
  }
  func.func @transform_1(%arg0: i32) -> (i32, i32, i32) {
    %c0_i32 = arith.constant 0 : i32
    %c0_i32_0 = arith.constant 0 : i32
    %c0_i32_1 = arith.constant 0 : i32
    %c0_i32_2 = arith.constant 0 : i32
    return %c0_i32, %c0_i32_0, %c0_i32_1 : i32, i32, i32
  }
  func.func @transform_2(%arg0: i32) -> (i32, i32) {
    %c0_i32 = arith.constant 0 : i32
    %c0_i32_0 = arith.constant 0 : i32
    %c0_i32_1 = arith.constant 0 : i32
    return %c0_i32, %c0_i32_0 : i32, i32
  }
  func.func @transform_3(%arg0: i32) -> (i32, i32, i32) {
    %c0_i32 = arith.constant 0 : i32
    %c0_i32_0 = arith.constant 0 : i32
    %c0_i32_1 = arith.constant 0 : i32
    %c0_i32_2 = arith.constant 0 : i32
    return %c0_i32, %c0_i32_0, %c0_i32_1 : i32, i32, i32
  }
  func.func @transform_4(%arg0: i32) -> (i32, i32) {
    %c0_i32 = arith.constant 0 : i32
    %c0_i32_0 = arith.constant 0 : i32
    %c0_i32_1 = arith.constant 0 : i32
    return %c0_i32, %c0_i32_0 : i32, i32
  }
  func.func @transform_5(%arg0: i32) -> (i32, i32) {
    %c0_i32 = arith.constant 0 : i32
    %c0_i32_0 = arith.constant 0 : i32
    %c0_i32_1 = arith.constant 0 : i32
    return %c0_i32, %c0_i32_0 : i32, i32
  }
  func.func @transform_6(%arg0: i32) -> (i32, i32) {
    %c0_i32 = arith.constant 0 : i32
    %c0_i32_0 = arith.constant 0 : i32
    %c0_i32_1 = arith.constant 0 : i32
    return %c0_i32, %c0_i32_0 : i32, i32
  }
  func.func @transform_7(%arg0: i32) -> (i32, i32, i32) {
    %c0_i32 = arith.constant 0 : i32
    %c0_i32_0 = arith.constant 0 : i32
    %c0_i32_1 = arith.constant 0 : i32
    %c0_i32_2 = arith.constant 0 : i32
    return %c0_i32, %c0_i32_0, %c0_i32_1 : i32, i32, i32
  }
  func.func @transform_8(%arg0: i32) -> (i32, i32) {
    %c0_i32 = arith.constant 0 : i32
    %c0_i32_0 = arith.constant 0 : i32
    %c0_i32_1 = arith.constant 0 : i32
    return %c0_i32, %c0_i32_0 : i32, i32
  }
  func.func @transform_9(%arg0: i32) -> (i32, i32, i32) {
    %c0_i32 = arith.constant 0 : i32
    %c0_i32_0 = arith.constant 0 : i32
    %c0_i32_1 = arith.constant 0 : i32
    %c0_i32_2 = arith.constant 0 : i32
    return %c0_i32, %c0_i32_0, %c0_i32_1 : i32, i32, i32
  }
  func.func @transform_10(%arg0: i32) -> (i32, i32) {
    %c0_i32 = arith.constant 0 : i32
    %c0_i32_0 = arith.constant 0 : i32
    %c0_i32_1 = arith.constant 0 : i32
    return %c0_i32, %c0_i32_0 : i32, i32
  }
  func.func @transform_11(%arg0: i32) -> (i32, i32) {
    %c0_i32 = arith.constant 0 : i32
    %c0_i32_0 = arith.constant 0 : i32
    %c0_i32_1 = arith.constant 0 : i32
    return %c0_i32, %c0_i32_0 : i32, i32
  }
  func.func @transform_12(%arg0: i32) -> (i32, i32) {
    %c0_i32 = arith.constant 0 : i32
    %c0_i32_0 = arith.constant 0 : i32
    %c0_i32_1 = arith.constant 0 : i32
    return %c0_i32, %c0_i32_0 : i32, i32
  }
  func.func @transform_13(%arg0: i32) -> (i32, i32) {
    %c0_i32 = arith.constant 0 : i32
    %c0_i32_0 = arith.constant 0 : i32
    return %arg0, %c0_i32 : i32, i32
  }
}

</mosaic_0001>

<bundles_post_ra>
// kernel: _lambda_.1
= control target key start
LH: loop header
LB: loop body
LE: loop exit
PB: predicated region body
PF: predicated region fallthrough
CT: control target
= control target key end

     0   :  { %18 = vsyncpa [#allocation3], 0  ;;  %s2415_s0 = inlined_call_operand.vmem [shape: f32[2,16,128], index: 0, kind: input, shape index: {}]   ;;  %s2416_s1 = inlined_call_operand.hbm [shape: bf16[2,128,128], index: 1, kind: input, shape index: {}]   ;;  %s2417_s2 = inlined_call_operand.vmem [shape: f32[1,128], index: 2, kind: input, shape index: {}]   ;;  %s2418_s3 = inlined_call_operand.hbm [shape: bf16[2,128,128], index: 3, kind: input, shape index: {}]   ;;  %s2419_s4 = inlined_call_operand.vmem [shape: f32[1,128], index: 4, kind: input, shape index: {}]   ;;  %s2420_s5 = inlined_call_operand.hbm [shape: bf16[128,128], index: 5, kind: input, shape index: {}]   ;;  %s2421_s6 = inlined_call_operand.vmem [shape: f32[1,128], index: 6, kind: input, shape index: {}]   ;;  %s2422_s7 = inlined_call_operand.hbm [shape: bf16[2,128,128], index: 7, kind: input, shape index: {}]   ;;  %s2423_s8 = inlined_call_operand.vmem [shape: f32[1,128], index: 8, kind: input, shape index: {}]   ;;  %s2424_s9 = inlined_call_operand.vmem [shape: bf16[2,128,128], index: 9, kind: input, shape index: {}]   ;;  %s2425_s10 = inlined_call_operand.vmem [shape: f32[1,128], index: 10, kind: input, shape index: {}]   ;;  %s2426_s11 = inlined_call_operand.hbm [shape: bf16[128,128], index: 11, kind: input, shape index: {}]   ;;  %s2427_s12 = inlined_call_operand.vmem [shape: f32[1,128], index: 12, kind: input, shape index: {}]   ;;  %s2428_s13 = inlined_call_operand.hbm [shape: f32[2,128], index: 13, kind: output, shape index: {}]  }
   0x1   :  { %19 = vsyncpa [#allocation6], 0 }
   0x2   :  { %20 = vsyncpa [#allocation9], 0 }
   0x3   :  { %21 = vsyncpa [#allocation4], 0  ;;  %s2109_s25 = smov [#allocation5]   ;;  %s2110_s27 = smov [#allocation8]  }
   0x4   :  { %s43_s26 = sshll.u32 %s2109_s25, 4  ;;  %s71_s28 = sshll.u32 %s2110_s27, 4  ;;  %s44_s26 = int_to_ptr.vmem [resolvable:$true] %s43_s26  ;;  %s2190_s28 = int_to_ptr.vmem [resolvable:$true] %s71_s28 }
   0x5   :  { %s1969_s14 = scalar_lea.hbm %s2418_s3, 2048 }
   0x6   :  { %p1970_p0 = scmp.ne.s32.totalorder %s2418_s3, %s1969_s14  ;;  %p1973_p1 = scmp.lt.u32.totalorder %s1969_s14, %s2418_s3 }
   0x8   :  { %p1975_p2 = pnand %p1973_p1, %p1970_p0 }
   0xa   :  { %1978 = shalt.err (!%p1975_p2)
}
   0xb   :  { %s1979_s19 = scalar_lea.vmem %s44_s26, 2048  ;;  %p1984_p4 = scmp.lt.s32.totalorder %s44_s26, %s44_s26 }
   0xc   :  { %p1980_p3 = scmp.ne.s32.totalorder %s44_s26, %s1979_s19  ;;  %p1985_p5 = scmp.lt.s32.totalorder %s1979_s19, %s1979_s19 }
   0xe   :  { %p1986_p6 = por %p1985_p5, %p1984_p4 }
  0x10   :  { %p1987_p7 = pnand %p1986_p6, %p1980_p3 }
  0x12   :  { %1990 = shalt.err (!%p1987_p7)
}
  0x13   :  { %s2111_s20 = smov 64   ;;  %s2112_s21 = smov 4  }
  0x14   :  { %49 = dma.hbm_to_vmem [thread:$0]  %s2418_s3, 2048, %s44_s26, [#allocation6], %s2111_s20, %s2111_s20, %s2112_s21  }
  0x15   :  { %s1991_s27 = scalar_lea.hbm %s2422_s7, 2048 }
  0x16   :  { %p1992_p8 = scmp.ne.s32.totalorder %s2422_s7, %s1991_s27  ;;  %p1995_p9 = scmp.lt.u32.totalorder %s1991_s27, %s2422_s7 }
  0x18   :  { %p1997_p10 = pnand %p1995_p9, %p1992_p8 }
  0x1a   :  { %2000 = shalt.err (!%p1997_p10)
}
  0x1b   :  { %s2001_s16 = scalar_lea.vmem %s2190_s28, 2048  ;;  %p2006_p12 = scmp.lt.s32.totalorder %s2190_s28, %s2190_s28 }
  0x1c   :  { %p2002_p11 = scmp.ne.s32.totalorder %s2190_s28, %s2001_s16  ;;  %p2007_p13 = scmp.lt.s32.totalorder %s2001_s16, %s2001_s16 }
  0x1e   :  { %p2008_p0 = por %p2007_p13, %p2006_p12 }
  0x20   :  { %p2009_p1 = pnand %p2008_p0, %p2002_p11 }
  0x22   :  { %2012 = shalt.err (!%p2009_p1)
}
  0x23   :  { %77 = dma.hbm_to_vmem [thread:$0]  %s2422_s7, 2048, %s2190_s28, [#allocation9], %s2111_s20, %s2111_s20, %s2112_s21  }
  0x24   :  { %s2113_s17 = smov [#allocation2]   ;;  %s2114_s19 = smov [#allocation7]  }
  0x25   :  { %s29_s18 = sshll.u32 %s2113_s17, 4  ;;  %s57_s22 = sshll.u32 %s2114_s19, 4  ;;  %s30_s18 = int_to_ptr.vmem [resolvable:$true] %s29_s18  ;;  %s2227_s22 = int_to_ptr.vmem [resolvable:$true] %s57_s22 }
  0x26   :  { %s2013_s25 = scalar_lea.hbm %s2416_s1, 2048 }
  0x27   :  { %p2014_p2 = scmp.ne.s32.totalorder %s2416_s1, %s2013_s25  ;;  %p2017_p3 = scmp.lt.u32.totalorder %s2013_s25, %s2416_s1 }
  0x29   :  { %p2019_p4 = pnand %p2017_p3, %p2014_p2 }
  0x2b   :  { %2022 = shalt.err (!%p2019_p4)
}
  0x2c   :  { %s2023_s7 = scalar_lea.vmem %s30_s18, 2048  ;;  %p2028_p6 = scmp.lt.s32.totalorder %s30_s18, %s30_s18 }
  0x2d   :  { %p2024_p5 = scmp.ne.s32.totalorder %s30_s18, %s2023_s7  ;;  %p2029_p7 = scmp.lt.s32.totalorder %s2023_s7, %s2023_s7 }
  0x2f   :  { %p2030_p8 = por %p2029_p7, %p2028_p6 }
  0x31   :  { %p2031_p9 = pnand %p2030_p8, %p2024_p5 }
  0x33   :  { %2034 = shalt.err (!%p2031_p9)
}
  0x34   :  { %35 = dma.hbm_to_vmem [thread:$0]  %s2416_s1, 2048, %s30_s18, [#allocation3], %s2111_s20, %s2111_s20, %s2112_s21  }
  0x35   :  { %s2035_s26 = scalar_lea.hbm %s2420_s5, 1024 }
  0x36   :  { %p2036_p10 = scmp.ne.s32.totalorder %s2420_s5, %s2035_s26  ;;  %p2039_p11 = scmp.lt.u32.totalorder %s2035_s26, %s2420_s5 }
  0x38   :  { %p2041_p12 = pnand %p2039_p11, %p2036_p10 }
  0x3a   :  { %2044 = shalt.err (!%p2041_p12)
}
  0x3b   :  { %s2045_s25 = scalar_lea.vmem %s2227_s22, 1024  ;;  %p2050_p0 = scmp.lt.s32.totalorder %s2227_s22, %s2227_s22 }
  0x3c   :  { %p2046_p13 = scmp.ne.s32.totalorder %s2227_s22, %s2045_s25  ;;  %p2051_p1 = scmp.lt.s32.totalorder %s2045_s25, %s2045_s25 }
  0x3e   :  { %p2052_p2 = por %p2051_p1, %p2050_p0 }
  0x40   :  { %p2053_p3 = pnand %p2052_p2, %p2046_p13 }
  0x42   :  { %2056 = shalt.err (!%p2053_p3)
}
  0x43   :  { %63 = dma.hbm_to_vmem [thread:$0]  %s2420_s5, 1024, %s2227_s22, [#allocation6], %s2111_s20, %s2111_s20, %s2112_s21  }
  0x44   :  { %s2115_s27 = smov [#allocation10]   ;;  %s2057_s7 = scalar_lea.hbm %s2426_s11, 1024 }
  0x45   :  { %s89_s29 = sshll.u32 %s2115_s27, 4  ;;  %p2058_p4 = scmp.ne.s32.totalorder %s2426_s11, %s2057_s7  ;;  %s90_s29 = int_to_ptr.vmem [resolvable:$true] %s89_s29 }
  0x46   :  { %p2061_p5 = scmp.lt.u32.totalorder %s2057_s7, %s2426_s11 }
  0x48   :  { %p2063_p6 = pnand %p2061_p5, %p2058_p4 }
  0x4a   :  { %2066 = shalt.err (!%p2063_p6)
}
  0x4b   :  { %s2067_s26 = scalar_lea.vmem %s90_s29, 1024  ;;  %p2072_p8 = scmp.lt.s32.totalorder %s90_s29, %s90_s29 }
  0x4c   :  { %p2068_p7 = scmp.ne.s32.totalorder %s90_s29, %s2067_s26  ;;  %p2073_p9 = scmp.lt.s32.totalorder %s2067_s26, %s2067_s26 }
  0x4e   :  { %p2074_p10 = por %p2073_p9, %p2072_p8 }
  0x50   :  { %p2075_p11 = pnand %p2074_p10, %p2068_p7 }
  0x52   :  { %2078 = shalt.err (!%p2075_p11)
}
  0x53   :  { %95 = dma.hbm_to_vmem [thread:$0]  %s2426_s11, 1024, %s90_s29, [#allocation9], %s2111_s20, %s2111_s20, %s2112_s21  }
  0x54   :  { %2101 = dma.done.wait [#allocation3], 2048  }
  0x55   :  { %2102 = vsyncadd [#allocation3], 4294965248 }
  0x56   :  { %2103 = dma.done.wait [#allocation6], 3072  }
  0x57   :  { %2104 = vsyncadd [#allocation6], 4294964224 }
  0x58   :  { %2105 = dma.done.wait [#allocation9], 3072  }
  0x59   :  { %2106 = vsyncadd [#allocation9], 4294964224  ;;  %v1889_v0 = vld [vmem:[#allocation2] sm:$0xff]   ;;  %v1890_v1 = vld [vmem:[#allocation2 + $0x8] sm:$0xff]   ;;  %vm141_vm0 = vcmask 1040384   ;;  %vm2116_vm2 = vmmov 1  }
  0x5a   :  { %1666 = vmatprep.subr.bf16.mxu0 %v1889_v0  ;;  %v1891_v2 = vld [vmem:[#allocation2 + $0x10] sm:$0xff]   ;;  %vm1441_vm1 = vmneg %vm141_vm0  ;;  %v1892_v3 = vld [vmem:[#allocation2 + $0x18] sm:$0xff]   ;;  %vm794_vm4 = vcmask 1041408   ;;  %vm2118_vm7 = vmmov 0   ;;  %vm1323_vm8 = vcmask 1041409   ;;  %s2119_s22 = smov [#allocation11]  }
  0x5b   :  { %1667 = vmatpush3.bf16.msra.mxu0 %v1889_v0  ;;  %v114_v4 = vld [vmem:[%s2415_s0] sm:$0xff]  ;;  %v115_v5 = vld [vmem:[%s2415_s0 + $0x8] sm:$0xff]  ;;  %vm2288_vm3 = vmpackc.low %vm2116_vm2, %vm1441_vm1 }
  0x5c   :  { %1668 = vmatprep.subr.bf16.mxu0 %v1890_v1  ;;  %v142_v6 = vrot.slane %v114_v4, 7  ;;  %v143_v7 = vrot.slane %v115_v5, 7  ;;  %v1893_v10 = vld [vmem:[#allocation2 + $0x20] sm:$0xff]   ;;  %v1894_v12 = vld [vmem:[#allocation2 + $0x28] sm:$0xff]   ;;  %v116_v13 = vld [vmem:[%s2415_s0 + $0x10] sm:$0xff]  ;;  %v118_v28 = vpack.c.bf16 %v115_v5, %v114_v4 }
  0x5d   :  { %v117_v14 = vld [vmem:[%s2415_s0 + $0x18] sm:$0xff]  ;;  %v1905_v15 = vld [vmem:[#allocation5] sm:$0xff]   ;;  %v1906_v16 = vld [vmem:[#allocation5 + $0x8] sm:$0xff]   ;;  %v145_v18 = vrot.slane %v116_v13, 7 }
  0x5e   :  { %v144_v8 = vsel %vm141_vm0, %v142_v6, %v143_v7  ;;  %v1895_v17 = vld [vmem:[#allocation2 + $0x30] sm:$0xff]   ;;  %1706 = vmatprep.subr.bf16.mxu1 %v1905_v15  ;;  %v1896_v19 = vld [vmem:[#allocation2 + $0x38] sm:$0xff]   ;;  %v146_v20 = vrot.slane %v117_v14, 7  ;;  %v1897_v23 = vld [vmem:[#allocation2 + $0x40] sm:$0xff]   ;;  %v119_v35 = vpack.c.bf16 %v117_v14, %v116_v13 }
  0x5f   :  { %1669 = vmatpush3.bf16.msra.mxu0 %v1890_v1  ;;  %v1443_v11 = vpack.c.bf16 %v144_v8, %v142_v6  ;;  %1707 = vmatpush3.bf16.msra.mxu1 %v1905_v15  ;;  %v1907_v21 = vld [vmem:[#allocation5 + $0x10] sm:$0xff]   ;;  %v1908_v22 = vld [vmem:[#allocation5 + $0x18] sm:$0xff]   ;;  %v1909_v25 = vld [vmem:[#allocation5 + $0x20] sm:$0xff]  }
  0x60   :  { %1670 = vmatprep.subr.bf16.mxu0 %v1891_v2  ;;  %1708 = vmatprep.subr.bf16.mxu1 %v1906_v16  ;;  %v147_v24 = vsel %vm141_vm0, %v145_v18, %v146_v20  ;;  %v1898_v27 = vld [vmem:[#allocation2 + $0x48] sm:$0xff]   ;;  %v1899_v29 = vld [vmem:[#allocation2 + $0x50] sm:$0xff]   ;;  %v1900_v30 = vld [vmem:[#allocation2 + $0x58] sm:$0xff]  }
  0x61   :  { %1682 = vmatprep.mubr.msk.bf16.mxu0 %vm2288_vm3, %v1443_v11  ;;  %v1447_v26 = vpack.c.bf16 %v147_v24, %v145_v18  ;;  %v1901_v31 = vld [vmem:[#allocation2 + $0x60] sm:$0xff]   ;;  %v1902_v32 = vld [vmem:[#allocation2 + $0x68] sm:$0xff]   ;;  %v1903_v33 = vld [vmem:[#allocation2 + $0x70] sm:$0xff]  }
  0x62   :  { %v1904_v34 = vld [vmem:[#allocation2 + $0x78] sm:$0xff]   ;;  %v1910_v36 = vld [vmem:[#allocation5 + $0x28] sm:$0xff]   ;;  %v1911_v37 = vld [vmem:[#allocation5 + $0x30] sm:$0xff]  }
  0x63   :  { %1671 = vmatpush3.bf16.msra.mxu0 %v1891_v2  ;;  %1709 = vmatpush3.bf16.msra.mxu1 %v1906_v16  ;;  %v1912_v38 = vld [vmem:[#allocation5 + $0x38] sm:$0xff]   ;;  %v1913_v39 = vld [vmem:[#allocation7] sm:$0xff]   ;;  %v1915_v41 = vld [vmem:[#allocation7 + $0x8] sm:$0xff]  }
  0x64   :  { %1672 = vmatprep.subr.bf16.mxu0 %v1892_v3  ;;  %1710 = vmatprep.subr.bf16.mxu1 %v1907_v21  ;;  %v1914_v40 = vld [vmem:[#allocation5 + $0x40] sm:$0xff]   ;;  %v1917_v42 = vld [vmem:[#allocation7 + $0x10] sm:$0xff]   ;;  %v1919_v43 = vld [vmem:[#allocation7 + $0x18] sm:$0xff]  }
  0x65   :  { %v1921_v44 = vld [vmem:[#allocation7 + $0x20] sm:$0xff]   ;;  %v1923_v45 = vld [vmem:[#allocation7 + $0x28] sm:$0xff]   ;;  %v1925_v46 = vld [vmem:[#allocation7 + $0x30] sm:$0xff]  }
  0x66   :  { %v1927_v47 = vld [vmem:[#allocation7 + $0x38] sm:$0xff]   ;;  %v1457_v48 = vld [vmem:[%s2417_s2] ss:$0 sm:$0xff]  ;;  %v1916_v7 = vld [vmem:[#allocation5 + $0x48] sm:$0xff]  }
  0x67   :  { %1673 = vmatpush3.bf16.msra.mxu0 %v1892_v3  ;;  %1711 = vmatpush3.bf16.msra.mxu1 %v1907_v21  ;;  %v1918_v8 = vld [vmem:[#allocation5 + $0x50] sm:$0xff]   ;;  %v1922_v11 = vld [vmem:[#allocation5 + $0x60] sm:$0xff]   ;;  %v1928_v9 = vld [vmem:[#allocation5 + $0x78] sm:$0xff]  }
  0x68   :  { %1674 = vmatprep.subr.bf16.mxu0 %v1893_v10  ;;  %1712 = vmatprep.subr.bf16.mxu1 %v1908_v22  ;;  %v1926_v13 = vld [vmem:[#allocation5 + $0x70] sm:$0xff]   ;;  %v1929_v14 = vld [vmem:[#allocation8] sm:$0xff]   ;;  %v1930_v15 = vld [vmem:[#allocation8 + $0x8] sm:$0xff]  }
  0x69   :  { %v1931_v16 = vld [vmem:[#allocation8 + $0x10] sm:$0xff]   ;;  %vm1500_vm5 = vmneg %vm794_vm4 }
  0x6a   :  { %v1935_v24 = vld [vmem:[#allocation8 + $0x30] sm:$0xff]   ;;  %vm2343_vm6 = vmpackc.low %vm2116_vm2, %vm1500_vm5 }
  0x6b   :  { %1675 = vmatpush3.bf16.msra.mxu0 %v1893_v10  ;;  %1713 = vmatpush3.bf16.msra.mxu1 %v1908_v22  ;;  %v1920_v10 = vld [vmem:[#allocation5 + $0x58] sm:$0xff]  }
  0x6c   :  { %1676 = vmatprep.subr.bf16.mxu0 %v1894_v12  ;;  %1714 = vmatprep.subr.bf16.mxu1 %v1909_v25 }
  0x6f   :  { %1677 = vmatpush3.bf16.msra.mxu0 %v1894_v12  ;;  %1715 = vmatpush3.bf16.msra.mxu1 %v1909_v25  ;;  %v1924_v12 = vld [vmem:[#allocation5 + $0x68] sm:$0xff]   ;;  %v1936_v25 = vld [vmem:[#allocation8 + $0x38] sm:$0xff]  }
  0x70   :  { %1678 = vmatprep.subr.bf16.mxu0 %v1895_v17  ;;  %1716 = vmatprep.subr.bf16.mxu1 %v1910_v36 }
  0x73   :  { %1679 = vmatpush3.bf16.msra.mxu0 %v1895_v17  ;;  %1717 = vmatpush3.bf16.msra.mxu1 %v1910_v36  ;;  %v1932_v17 = vld [vmem:[#allocation8 + $0x18] sm:$0xff]  }
  0x74   :  { %1680 = vmatprep.subr.bf16.mxu0 %v1896_v19  ;;  %1718 = vmatprep.subr.bf16.mxu1 %v1911_v37 }
  0x77   :  { %1681 = vmatpush3.bf16.msra.mxu0 %v1896_v19  ;;  %1719 = vmatpush3.bf16.msra.mxu1 %v1911_v37  ;;  %v1933_v19 = vld [vmem:[#allocation8 + $0x20] sm:$0xff]  }
  0x78   :  { %1686 = vmatprep.subr.bf16.mxu0 %v1897_v23  ;;  %1720 = vmatprep.subr.bf16.mxu1 %v1912_v38 }
  0x7a   :  { %1683 = vmatmul.mubr.msk.bf16.vlgmr.msra.gmra.mrb[0].mxu0 %vm2288_vm3, %v1447_v26  ;;  %v1937_v26 = vld [vmem:[#allocation8 + $0x40] sm:$0xff]  }
  0x7b   :  { %1687 = vmatpush3.bf16.msra.mxu0 %v1897_v23  ;;  %1702 = vmatprep.mubr.bf16.mxu0 %v118_v28  ;;  %v1934_v23 = vld [vmem:[#allocation8 + $0x28] sm:$0xff]  }
  0x7c   :  { %1688 = vmatprep.subr.bf16.mxu0 %v1898_v27  ;;  %1721 = vmatpush3.bf16.msra.mxu1 %v1912_v38 }
  0x7d   :  { %1726 = vmatprep.subr.bf16.mxu1 %v1914_v40 }
  0x7f   :  { %1689 = vmatpush3.bf16.msra.mxu0 %v1898_v27  ;;  %v1945_v27 = vld [vmem:[%s2424_s9] sm:$0xff]  }
  0x80   :  { %1690 = vmatprep.subr.bf16.mxu0 %v1899_v29 }
  0x83   :  { %1691 = vmatpush3.bf16.msra.mxu0 %v1899_v29  ;;  %v1947_v29 = vld [vmem:[%s2424_s9 + $0x10] sm:$0xff]  }
  0x84   :  { %1692 = vmatprep.subr.bf16.mxu0 %v1900_v30 }
  0x87   :  { %1693 = vmatpush3.bf16.msra.mxu0 %v1900_v30  ;;  %v1948_v30 = vld [vmem:[%s2424_s9 + $0x18] sm:$0xff]  }
  0x88   :  { %1694 = vmatprep.subr.bf16.mxu0 %v1901_v31 }
  0x8b   :  { %1695 = vmatpush3.bf16.msra.mxu0 %v1901_v31  ;;  %v1949_v31 = vld [vmem:[%s2424_s9 + $0x20] sm:$0xff]  }
  0x8c   :  { %1696 = vmatprep.subr.bf16.mxu0 %v1902_v32 }
  0x8f   :  { %1697 = vmatpush3.bf16.msra.mxu0 %v1902_v32  ;;  %v1483_v32 = vld [vmem:[%s2421_s6] ss:$0 sm:$0xff] }
  0x90   :  { %1698 = vmatprep.subr.bf16.mxu0 %v1903_v33 }
  0x93   :  { %1699 = vmatpush3.bf16.msra.mxu0 %v1903_v33  ;;  %v1482_v33 = vld [vmem:[%s2419_s4] ss:$0 sm:$0xff]  ;;  %s1422_s4 = sshll.u32 %s2119_s22, 4  ;;  %s1423_s4 = int_to_ptr.vmem [resolvable:$true] %s1422_s4 }
  0x94   :  { %1700 = vmatprep.subr.bf16.mxu0 %v1904_v34  ;;  %s2079_s6 = scalar_lea.vmem %s1423_s4, 32  ;;  %p2084_p13 = scmp.lt.s32.totalorder %s1423_s4, %s1423_s4 }
  0x95   :  { %p2080_p12 = scmp.ne.s32.totalorder %s1423_s4, %s2079_s6  ;;  %p2085_p0 = scmp.lt.s32.totalorder %s2079_s6, %s2079_s6 }
  0x97   :  { %1701 = vmatpush3.bf16.msra.mxu0 %v1904_v34  ;;  %p2086_p1 = por %p2085_p0, %p2084_p13 }
  0x98   :  { %1746 = vmatprep.subr.bf16.mxu0 %v1913_v39 }
  0x99   :  { %p2087_p2 = pnand %p2086_p1, %p2080_p12 }
  0x9a   :  { %1703 = vmatmul.mubr.bf16.vlgmr.msra.gmra.mrb[0].mxu0 %v119_v35 }
  0x9b   :  { %1762 = vmatprep.mubr.bf16.mxu0 %v118_v28  ;;  %1747 = vmatpush3.bf16.msra.mxu0 %v1913_v39  ;;  %v1946_v28 = vld [vmem:[%s2424_s9 + $0x8] sm:$0xff]  }
  0x9c   :  { %1748 = vmatprep.subr.bf16.mxu0 %v1915_v41 }
  0x9f   :  { %1749 = vmatpush3.bf16.msra.mxu0 %v1915_v41 }
  0xa0   :  { %1750 = vmatprep.subr.bf16.mxu0 %v1917_v42 }
  0xa3   :  { %1751 = vmatpush3.bf16.msra.mxu0 %v1917_v42 }
  0xa4   :  { %1752 = vmatprep.subr.bf16.mxu0 %v1919_v43 }
  0xa7   :  { %1753 = vmatpush3.bf16.msra.mxu0 %v1919_v43 }
  0xa8   :  { %1754 = vmatprep.subr.bf16.mxu0 %v1921_v44 }
  0xab   :  { %1755 = vmatpush3.bf16.msra.mxu0 %v1921_v44 }
  0xac   :  { %1756 = vmatprep.subr.bf16.mxu0 %v1923_v45 }
  0xaf   :  { %1757 = vmatpush3.bf16.msra.mxu0 %v1923_v45 }
  0xb0   :  { %1758 = vmatprep.subr.bf16.mxu0 %v1925_v46 }
  0xb3   :  { %1759 = vmatpush3.bf16.msra.mxu0 %v1925_v46 }
  0xb4   :  { %1760 = vmatprep.subr.bf16.mxu0 %v1927_v47 }
  0xb7   :  { %1761 = vmatpush3.bf16.msra.mxu0 %v1927_v47 }
  0xb8   :  { %1806 = vmatprep.subr.bf16.mxu0 %v1945_v27 }
  0xba   :  { %1763 = vmatmul.mubr.bf16.vlgmr.msra.gmra.mrb[4].mxu0 %v119_v35 }
  0xbb   :  { %1807 = vmatpush3.bf16.msra.mxu0 %v1945_v27 }
  0xbc   :  { %1808 = vmatprep.subr.bf16.mxu0 %v1946_v28 }
  0xbf   :  { %1809 = vmatpush3.bf16.msra.mxu0 %v1946_v28 }
  0xc0   :  { %1810 = vmatprep.subr.bf16.mxu0 %v1947_v29 }
  0xc3   :  { %1811 = vmatpush3.bf16.msra.mxu0 %v1947_v29 }
  0xc4   :  { %1812 = vmatprep.subr.bf16.mxu0 %v1948_v30 }
  0xc7   :  { %1813 = vmatpush3.bf16.msra.mxu0 %v1948_v30 }
  0xc8   :  { %1814 = vmatprep.subr.bf16.mxu0 %v1949_v31 }
  0xcb   :  { %1815 = vmatpush3.bf16.msra.mxu0 %v1949_v31 }
 0x16d   :  { %v1704_v49 = vpop.f32.mrb[0].mxu0 }
 0x16e   :  { %v375_v50 = vadd.f32 %v1704_v49, %v1457_v48  ;;  %v351_v51 = vpop.f32.mrb[1].mxu0 }
 0x16f   :  { %v373_v52 = vadd.f32 %v1457_v48, %v351_v51  ;;  %v1705_v53 = vpop.f32.mrb[2].mxu0 }
 0x170   :  { %v379_v54 = vmax.f32 %v375_v50, 0.0  ;;  %v376_v55 = vadd.f32 %v1705_v53, %v1457_v48  ;;  %v354_v56 = vpop.f32.mrb[3].mxu0 }
 0x171   :  { %v377_v57 = vmax.f32 %v373_v52, 0.0  ;;  %v374_v58 = vadd.f32 %v1457_v48, %v354_v56 }
 0x172   :  { %v380_v59 = vmax.f32 %v376_v55, 0.0  ;;  %v407_v61 = vrot.slane %v379_v54, 7 }
 0x173   :  { %v378_v60 = vmax.f32 %v374_v58, 0.0  ;;  %v404_v0 = vrot.slane %v377_v57, 7 }
 0x174   :  { %v382_v62 = vpack.c.bf16 %v380_v59, %v379_v54  ;;  %v408_v63 = vrot.slane %v380_v59, 7 }
 0x175   :  { %v381_v1 = vpack.c.bf16 %v378_v60, %v377_v57  ;;  %v405_v2 = vrot.slane %v378_v60, 7 }
 0x176   :  { %v409_v3 = vsel %vm141_vm0, %v407_v61, %v408_v63 }
 0x177   :  { %v406_v4 = vsel %vm141_vm0, %v404_v0, %v405_v2  ;;  %v1472_v5 = vpack.c.bf16 %v409_v3, %v407_v61  ;;  %v1938_v3 = vld [vmem:[#allocation8 + $0x48] sm:$0xff]  }
 0x178   :  { %v1468_v6 = vpack.c.bf16 %v406_v4, %v404_v0  ;;  %v1557_v0 = vld [vmem:[%s2425_s10] ss:$0 sm:$0xff] }
 0x17a   :  { %1722 = vmatprep.mubr.msk.bf16.mxu1 %vm2288_vm3, %v1468_v6  ;;  %v1940_v6 = vld [vmem:[#allocation8 + $0x58] sm:$0xff]  }
 0x17b   :  { %1723 = vmatmul.mubr.msk.bf16.vlgmr.msra.gmra.mrb[0].mxu1 %vm2288_vm3, %v1472_v5  ;;  %v1939_v5 = vld [vmem:[#allocation8 + $0x50] sm:$0xff]  }
 0x17c   :  { %1727 = vmatpush3.bf16.msra.mxu1 %v1914_v40  ;;  %1742 = vmatprep.mubr.bf16.mxu1 %v381_v1 }
 0x17d   :  { %1728 = vmatprep.subr.bf16.mxu1 %v1916_v7 }
 0x180   :  { %1729 = vmatpush3.bf16.msra.mxu1 %v1916_v7  ;;  %v1941_v7 = vld [vmem:[#allocation8 + $0x60] sm:$0xff]  }
 0x181   :  { %1730 = vmatprep.subr.bf16.mxu1 %v1918_v8 }
 0x184   :  { %1731 = vmatpush3.bf16.msra.mxu1 %v1918_v8  ;;  %v1942_v8 = vld [vmem:[#allocation8 + $0x68] sm:$0xff]  }
 0x185   :  { %1732 = vmatprep.subr.bf16.mxu1 %v1920_v10 }
 0x188   :  { %1733 = vmatpush3.bf16.msra.mxu1 %v1920_v10  ;;  %v1943_v10 = vld [vmem:[#allocation8 + $0x70] sm:$0xff]  }
 0x189   :  { %1734 = vmatprep.subr.bf16.mxu1 %v1922_v11 }
 0x18c   :  { %1735 = vmatpush3.bf16.msra.mxu1 %v1922_v11  ;;  %v1944_v11 = vld [vmem:[#allocation8 + $0x78] sm:$0xff]  }
 0x18d   :  { %1736 = vmatprep.subr.bf16.mxu1 %v1924_v12  ;;  %v1764_v18 = vpop.f32.mrb[4].mxu0 }
 0x18e   :  { %v748_v20 = vpop.f32.mrb[5].mxu0  ;;  %v757_v35 = vadd.f32 %v1764_v18, %v1483_v32 }
 0x18f   :  { %v1765_v21 = vpop.f32.mrb[6].mxu0  ;;  %v749_v38 = vadd.f32 %v1483_v32, %v748_v20 }
 0x190   :  { %1737 = vmatpush3.bf16.msra.mxu1 %v1924_v12  ;;  %v751_v22 = vpop.f32.mrb[7].mxu0  ;;  %v760_v47 = vadd.f32 %v1765_v21, %v1483_v32 }
 0x191   :  { %1738 = vmatprep.subr.bf16.mxu1 %v1926_v13  ;;  %v752_v50 = vadd.f32 %v1483_v32, %v751_v22 }
 0x194   :  { %1739 = vmatpush3.bf16.msra.mxu1 %v1926_v13  ;;  %v1950_v13 = vld [vmem:[%s2424_s9 + $0x28] sm:$0xff]  }
 0x195   :  { %1740 = vmatprep.subr.bf16.mxu1 %v1928_v9  ;;  %1816 = vmatprep.subr.bf16.mxu0 %v1950_v13 }
 0x196   :  { %1817 = vmatpush3.bf16.msra.mxu0 %v1950_v13 }
 0x198   :  { %1741 = vmatpush3.bf16.msra.mxu1 %v1928_v9  ;;  %v1951_v9 = vld [vmem:[%s2424_s9 + $0x30] sm:$0xff]  }
 0x199   :  { %1766 = vmatprep.subr.bf16.mxu1 %v1929_v14  ;;  %1818 = vmatprep.subr.bf16.mxu0 %v1951_v9 }
 0x19a   :  { %1819 = vmatpush3.bf16.msra.mxu0 %v1951_v9 }
 0x19b   :  { %1743 = vmatmul.mubr.bf16.vlgmr.msra.gmra.mrb[0].mxu1 %v382_v62 }
 0x19c   :  { %1767 = vmatpush3.bf16.msra.mxu1 %v1929_v14  ;;  %v1952_v14 = vld [vmem:[%s2424_s9 + $0x38] sm:$0xff]  }
 0x19d   :  { %1768 = vmatprep.subr.bf16.mxu1 %v1930_v15  ;;  %1820 = vmatprep.subr.bf16.mxu0 %v1952_v14 }
 0x19e   :  { %1821 = vmatpush3.bf16.msra.mxu0 %v1952_v14 }
 0x1a0   :  { %1769 = vmatpush3.bf16.msra.mxu1 %v1930_v15  ;;  %v1953_v15 = vld [vmem:[%s2424_s9 + $0x40] sm:$0xff]  }
 0x1a1   :  { %1770 = vmatprep.subr.bf16.mxu1 %v1931_v16  ;;  %1826 = vmatprep.subr.bf16.mxu0 %v1953_v15 }
 0x1a4   :  { %1771 = vmatpush3.bf16.msra.mxu1 %v1931_v16  ;;  %v1516_v16 = vld [vmem:[%s2423_s8] ss:$0 sm:$0xff] }
 0x1a5   :  { %1772 = vmatprep.subr.bf16.mxu1 %v1932_v17 }
 0x1a8   :  { %1773 = vmatpush3.bf16.msra.mxu1 %v1932_v17 }
 0x1a9   :  { %1774 = vmatprep.subr.bf16.mxu1 %v1933_v19 }
 0x1ac   :  { %1775 = vmatpush3.bf16.msra.mxu1 %v1933_v19 }
 0x1ad   :  { %1776 = vmatprep.subr.bf16.mxu1 %v1934_v23 }
 0x1b0   :  { %1777 = vmatpush3.bf16.msra.mxu1 %v1934_v23 }
 0x1b1   :  { %1778 = vmatprep.subr.bf16.mxu1 %v1935_v24 }
 0x1b4   :  { %1779 = vmatpush3.bf16.msra.mxu1 %v1935_v24 }
 0x1b5   :  { %1780 = vmatprep.subr.bf16.mxu1 %v1936_v25 }
 0x1b8   :  { %1781 = vmatpush3.bf16.msra.mxu1 %v1936_v25 }
 0x1b9   :  { %1786 = vmatprep.subr.bf16.mxu1 %v1937_v26 }
 0x26e   :  { %v1744_v34 = vpop.f32.mrb[0].mxu1 }
 0x26f   :  { %v637_v36 = vadd.f32 %v1744_v34, %v1482_v33  ;;  %v613_v37 = vpop.f32.mrb[1].mxu1 }
 0x270   :  { %v635_v39 = vadd.f32 %v1482_v33, %v613_v37  ;;  %v1745_v40 = vpop.f32.mrb[2].mxu1 }
 0x271   :  { %v641_v41 = vmax.f32 %v637_v36, 0.0  ;;  %v638_v42 = vadd.f32 %v1745_v40, %v1482_v33  ;;  %v616_v43 = vpop.f32.mrb[3].mxu1  ;;  %v1955_v40 = vld [vmem:[%s2424_s9 + $0x50] sm:$0xff]  }
 0x272   :  { %v639_v44 = vmax.f32 %v635_v39, 0.0  ;;  %v636_v45 = vadd.f32 %v1482_v33, %v616_v43  ;;  %v1954_v39 = vld [vmem:[%s2424_s9 + $0x48] sm:$0xff]  }
 0x273   :  { %v765_v46 = vadd.f32 %v757_v35, %v641_v41  ;;  %v642_v48 = vmax.f32 %v638_v42, 0.0  ;;  %v1956_v41 = vld [vmem:[%s2424_s9 + $0x58] sm:$0xff]   ;;  %v1957_v42 = vld [vmem:[%s2424_s9 + $0x60] sm:$0xff]   ;;  %v1958_v43 = vld [vmem:[%s2424_s9 + $0x68] sm:$0xff]  }
 0x274   :  { %v763_v49 = vadd.f32 %v749_v38, %v639_v44  ;;  %v640_v51 = vmax.f32 %v636_v45, 0.0  ;;  %v1959_v44 = vld [vmem:[%s2424_s9 + $0x70] sm:$0xff]   ;;  %v1960_v45 = vld [vmem:[%s2424_s9 + $0x78] sm:$0xff]  }
 0x275   :  { %v769_v52 = vmax.f32 %v765_v46, 0.0  ;;  %v766_v53 = vadd.f32 %v760_v47, %v642_v48  ;;  %v1961_v46 = vld [vmem:[#allocation10] sm:$0xff]   ;;  %v2117_v47 = vmov 0.0   ;;  %v1962_v48 = vld [vmem:[#allocation10 + $0x8] sm:$0xff]  }
 0x276   :  { %v767_v54 = vmax.f32 %v763_v49, 0.0  ;;  %v764_v55 = vadd.f32 %v752_v50, %v640_v51  ;;  %v1963_v49 = vld [vmem:[#allocation10 + $0x10] sm:$0xff]   ;;  %v1964_v50 = vld [vmem:[#allocation10 + $0x18] sm:$0xff]   ;;  %v1965_v51 = vld [vmem:[#allocation10 + $0x20] sm:$0xff]  }
 0x277   :  { %v2333_v56 = vmax.f32 %v766_v53, 0.0  ;;  %v798_v58 = vrot.slane %v769_v52, 6  ;;  %v1967_v53 = vld [vmem:[#allocation10 + $0x30] sm:$0xff]  }
 0x278   :  { %v2335_v57 = vmax.f32 %v764_v55, 0.0  ;;  %v795_v60 = vrot.slane %v767_v54, 6 }
 0x279   :  { %v799_v59 = vrot.slane %v2333_v56, 6  ;;  %v772_v12 = vpack.c.bf16 %v2333_v56, %v769_v52  ;;  %v1966_v52 = vld [vmem:[#allocation10 + $0x28] sm:$0xff]  }
 0x27a   :  { %v796_v61 = vrot.slane %v2335_v57, 6  ;;  %v771_v4 = vpack.c.bf16 %v2335_v57, %v767_v54  ;;  %v1968_v54 = vld [vmem:[#allocation10 + $0x38] sm:$0xff]  }
 0x27b   :  { %v800_v62 = vsel %vm794_vm4, %v798_v58, %v799_v59 }
 0x27c   :  { %v797_v63 = vsel %vm794_vm4, %v795_v60, %v796_v61  ;;  %v1506_v2 = vpack.c.bf16 %v800_v62, %v798_v58 }
 0x27d   :  { %v1502_v1 = vpack.c.bf16 %v797_v63, %v795_v60 }
 0x27f   :  { %1782 = vmatprep.mubr.msk.bf16.mxu1 %vm2343_vm6, %v1502_v1 }
 0x280   :  { %1783 = vmatmul.mubr.msk.bf16.vlgmr.msra.gmra.mrb[4].mxu1 %vm2343_vm6, %v1506_v2 }
 0x281   :  { %1787 = vmatpush3.bf16.msra.mxu1 %v1937_v26  ;;  %1802 = vmatprep.mubr.bf16.mxu1 %v771_v4 }
 0x282   :  { %1788 = vmatprep.subr.bf16.mxu1 %v1938_v3 }
 0x285   :  { %1789 = vmatpush3.bf16.msra.mxu1 %v1938_v3 }
 0x286   :  { %1790 = vmatprep.subr.bf16.mxu1 %v1939_v5 }
 0x289   :  { %1791 = vmatpush3.bf16.msra.mxu1 %v1939_v5 }
 0x28a   :  { %1792 = vmatprep.subr.bf16.mxu1 %v1940_v6 }
 0x28d   :  { %1793 = vmatpush3.bf16.msra.mxu1 %v1940_v6 }
 0x28e   :  { %1794 = vmatprep.subr.bf16.mxu1 %v1941_v7 }
 0x291   :  { %1795 = vmatpush3.bf16.msra.mxu1 %v1941_v7 }
 0x292   :  { %1796 = vmatprep.subr.bf16.mxu1 %v1942_v8 }
 0x295   :  { %1797 = vmatpush3.bf16.msra.mxu1 %v1942_v8 }
 0x296   :  { %1798 = vmatprep.subr.bf16.mxu1 %v1943_v10 }
 0x299   :  { %1799 = vmatpush3.bf16.msra.mxu1 %v1943_v10 }
 0x29a   :  { %1800 = vmatprep.subr.bf16.mxu1 %v1944_v11 }
 0x29d   :  { %1801 = vmatpush3.bf16.msra.mxu1 %v1944_v11 }
 0x29e   :  { %1846 = vmatprep.subr.bf16.mxu1 %v2117_v47 }
 0x2a0   :  { %1803 = vmatmul.mubr.bf16.vlgmr.msra.gmra.mrb[4].mxu1 %v772_v12 }
 0x2a1   :  { %1847 = vmatpush3.bf16.msra.mxu1 %v1961_v46  ;;  %1862 = vmatprep.mubr.msk.bf16.mxu1 %vm2118_vm7, %v2117_v47 }
 0x2a2   :  { %1848 = vmatprep.subr.bf16.mxu1 %v2117_v47 }
 0x2a5   :  { %1849 = vmatpush3.bf16.msra.mxu1 %v1962_v48 }
 0x2a6   :  { %1850 = vmatprep.subr.bf16.mxu1 %v2117_v47 }
 0x2a9   :  { %1851 = vmatpush3.bf16.msra.mxu1 %v1963_v49 }
 0x2aa   :  { %1852 = vmatprep.subr.bf16.mxu1 %v2117_v47 }
 0x2ad   :  { %1853 = vmatpush3.bf16.msra.mxu1 %v1964_v50 }
 0x2ae   :  { %1854 = vmatprep.subr.bf16.mxu1 %v2117_v47 }
 0x2b1   :  { %1855 = vmatpush3.bf16.msra.mxu1 %v1965_v51 }
 0x2b2   :  { %1856 = vmatprep.subr.bf16.mxu1 %v2117_v47 }
 0x2b5   :  { %1857 = vmatpush3.bf16.msra.mxu1 %v1966_v52 }
 0x2b6   :  { %1858 = vmatprep.subr.bf16.mxu1 %v2117_v47 }
 0x2b9   :  { %1859 = vmatpush3.bf16.msra.mxu1 %v1967_v53 }
 0x2ba   :  { %1860 = vmatprep.subr.bf16.mxu1 %v2117_v47 }
 0x2bd   :  { %1861 = vmatpush3.bf16.msra.mxu1 %v1968_v54 }
 0x373   :  { %v1804_v17 = vpop.f32.mrb[4].mxu1 }
 0x374   :  { %v1028_v18 = vadd.f32 %v1804_v17, %v1516_v16  ;;  %v1004_v19 = vpop.f32.mrb[5].mxu1 }
 0x375   :  { %v1026_v20 = vadd.f32 %v1516_v16, %v1004_v19  ;;  %v1805_v21 = vpop.f32.mrb[6].mxu1 }
 0x376   :  { %v1032_v22 = vmax.f32 %v1028_v18, 0.0  ;;  %v1029_v23 = vadd.f32 %v1805_v21, %v1516_v16  ;;  %v1007_v24 = vpop.f32.mrb[7].mxu1 }
 0x377   :  { %v1030_v25 = vmax.f32 %v1026_v20, 0.0  ;;  %v1027_v26 = vadd.f32 %v1516_v16, %v1007_v24  ;;  %v1558_v20 = vld [vmem:[%s2427_s12] ss:$0 sm:$0xff] }
 0x378   :  { %v1033_v27 = vmax.f32 %v1029_v23, 0.0  ;;  %v1060_v29 = vrot.slane %v1032_v22, 6 }
 0x379   :  { %v1031_v28 = vmax.f32 %v1027_v26, 0.0  ;;  %v1057_v32 = vrot.slane %v1030_v25, 6 }
 0x37a   :  { %v1035_v30 = vpack.c.bf16 %v1033_v27, %v1032_v22  ;;  %v1061_v31 = vrot.slane %v1033_v27, 6 }
 0x37b   :  { %v1034_v33 = vpack.c.bf16 %v1031_v28, %v1030_v25  ;;  %v1058_v34 = vrot.slane %v1031_v28, 6 }
 0x37c   :  { %v1062_v35 = vsel %vm794_vm4, %v1060_v29, %v1061_v31 }
 0x37d   :  { %v1547_v36 = vpack.c.bf16 %v1062_v35, %v1060_v29  ;;  %v1059_v37 = vsel %vm794_vm4, %v1057_v32, %v1058_v34 }
 0x37e   :  { %v1543_v38 = vpack.c.bf16 %v1059_v37, %v1057_v32 }
 0x380   :  { %1822 = vmatprep.mubr.msk.bf16.mxu0 %vm2343_vm6, %v1543_v38 }
 0x381   :  { %1823 = vmatmul.mubr.msk.bf16.vlgmr.msra.gmra.mrb[8].mxu0 %vm2343_vm6, %v1547_v36 }
 0x382   :  { %1827 = vmatpush3.bf16.msra.mxu0 %v1953_v15  ;;  %1842 = vmatprep.mubr.bf16.mxu0 %v1034_v33 }
 0x383   :  { %1828 = vmatprep.subr.bf16.mxu0 %v1954_v39 }
 0x386   :  { %1829 = vmatpush3.bf16.msra.mxu0 %v1954_v39 }
 0x387   :  { %1830 = vmatprep.subr.bf16.mxu0 %v1955_v40 }
 0x38a   :  { %1831 = vmatpush3.bf16.msra.mxu0 %v1955_v40 }
 0x38b   :  { %1832 = vmatprep.subr.bf16.mxu0 %v1956_v41 }
 0x38e   :  { %1833 = vmatpush3.bf16.msra.mxu0 %v1956_v41 }
 0x38f   :  { %1834 = vmatprep.subr.bf16.mxu0 %v1957_v42 }
 0x392   :  { %1835 = vmatpush3.bf16.msra.mxu0 %v1957_v42 }
 0x393   :  { %1836 = vmatprep.subr.bf16.mxu0 %v1958_v43 }
 0x396   :  { %1837 = vmatpush3.bf16.msra.mxu0 %v1958_v43 }
 0x397   :  { %1838 = vmatprep.subr.bf16.mxu0 %v1959_v44 }
 0x39a   :  { %1839 = vmatpush3.bf16.msra.mxu0 %v1959_v44 }
 0x39b   :  { %1840 = vmatprep.subr.bf16.mxu0 %v1960_v45 }
 0x39e   :  { %1841 = vmatpush3.bf16.msra.mxu0 %v1960_v45 }
 0x3a1   :  { %1843 = vmatmul.mubr.bf16.vlgmr.msra.gmra.mrb[12].mxu0 %v1035_v30 }
 0x454   :  { %v1824_v55 = vpop.f32.mrb[8].mxu0 }
 0x455   :  { %v1169_v58 = vpop.f32.mrb[9].mxu0 }
 0x456   :  { %v1825_v59 = vpop.f32.mrb[10].mxu0 }
 0x457   :  { %v1171_v60 = vpop.f32.mrb[11].mxu0 }
 0x474   :  { %v1844_v61 = vpop.f32.mrb[12].mxu0 }
 0x475   :  { %v1264_v62 = vpop.f32.mrb[13].mxu0 }
 0x476   :  { %v1845_v63 = vpop.f32.mrb[14].mxu0 }
 0x477   :  { %v1274_v1 = vadd.f32 %v1845_v63, %v1825_v59  ;;  %v1266_v2 = vpop.f32.mrb[15].mxu0 }
 0x478   :  { %v1267_v3 = vadd.f32 %v1266_v2, %v1171_v60 }
 0x479   :  { %v1285_v4 = vadd.f32 %v1557_v0, %v1274_v1 }
 0x47a   :  { %v1284_v5 = vadd.f32 %v1557_v0, %v1267_v3 }
 0x47b   :  { %v1287_v6 = vmax.f32 %v1285_v4, 0.0 }
 0x47c   :  { %v1286_v7 = vmax.f32 %v1284_v5, 0.0 }
 0x47d   :  { %v1289_v8 = vadd.f32 %v1287_v6, %v2333_v56 }
 0x47e   :  { %v1288_v10 = vadd.f32 %v1286_v7, %v2335_v57 }
 0x47f   :  { %v1291_v11 = vmax.f32 %v1289_v8, 0.0 }
 0x480   :  { %v1290_v12 = vmax.f32 %v1288_v10, 0.0 }
 0x481   :  { %v1293_v13 = vpack.c.bf16 %v1291_v11, %v1291_v11 }
 0x482   :  { %v1292_v9 = vpack.c.bf16 %v1290_v12, %v1290_v12 }
 0x483   :  { %v1320_v14 = vunpack.c.l.b16 %v1293_v13 }
 0x484   :  { %v1319_v15 = vunpack.c.l.b16 %v1292_v9 }
 0x485   :  { %v1322_v16 = vrot.slane %v1320_v14, 6 }
 0x486   :  { %v1321_v17 = vrot.slane %v1319_v15, 7 }
 0x488   :  { %v1324_v18 = vsel %vm1323_vm8, %v1322_v16, %v1321_v17 }
 0x489   :  { %v1325_v19 = vpack.c.b16 %v1324_v18, %v1324_v18 }
 0x48b   :  { %1863 = vmatmul.mubr.bf16.vlgmr.msra.gmra.mrb[8].mxu1 %v1325_v19 }
 0x55e   :  { %v1409_v56 = vpop.f32.mrb[8].mxu1 }
 0x55f   :  { %v1410_v57 = vadd.f32 %v1558_v20, %v1409_v56  ;;  %v1864_v21 = vpop.f32.mrb[9].mxu1 }
 0x560   :  { %v1412_v22 = vpop.f32.mrb[10].mxu1 }
 0x561   :  { %1415 = vst [vmem:[#allocation11] sm:$0x3] %v1410_v57  ;;  %v1865_v23 = vpop.f32.mrb[11].mxu1 }
 0x562   :  { %2090 = shalt.err (!%p2087_p2)
}
 0x563   :  { %s2091_s12 = scalar_lea.hbm %s2428_s13, 32 }
 0x564   :  { %p2092_p3 = scmp.ne.s32.totalorder %s2428_s13, %s2091_s12  ;;  %p2095_p4 = scmp.lt.u32.totalorder %s2091_s12, %s2428_s13 }
 0x566   :  { %p2097_p5 = pnand %p2095_p4, %p2092_p3 }
 0x568   :  { %2100 = shalt.err (!%p2097_p5)
}
 0x569   :  { %1425 = dma.vmem_to_hbm [thread:$0]  %s1423_s4, 32, %s2428_s13, [#allocation4]  }
 0x56a   :  { %2107 = dma.done.wait [#allocation4], 32  }
 0x56b   :  { %2108 = vsyncadd [#allocation4], 4294967264 }
 0x56c   :  { %1429 = vsyncpa [#allocation3], 1 }
 0x56d   :  { %1430 = vsyncpa [#allocation6], 1 }
 0x56e   :  { %1431 = vsyncpa [#allocation9], 1 }
 0x56f   :  { %1432 = vsyncpa [#allocation4], 1 }

</bundles_post_ra>
